<compile_context>
chip_gen: v7x
topology: tpu7x:2x2x1
jax: 0.10.0
libtpu: 0.0.40
codegen_flags: <defaults>
</compile_context>

<pallas_src>
import functools
import math

import jax
import jax.numpy as jnp
from jax import lax
from jax.experimental import pallas as pl
from jax.experimental.pallas import tpu as pltpu


def _round_up(x, m):
    return ((x + m - 1) // m) * m


def _cdiv(a, b):
    return (a + b - 1) // b


# ---------------------------------------------------------------------------
# Fast path: VMEM-resident table, one-hot gather on the MXU.
# ---------------------------------------------------------------------------
def _onehot_embed_kernel(ids_ref, emb_ref, out_ref, *, scale, vocab):
    """ids_ref: (TT, 1) int32; emb_ref: (V, E) resident in VMEM; out_ref: (TT, E)."""
    # nn.Embedding would raise on OOB ids; clamp so the gather stays in range.
    ids = jnp.clip(ids_ref[...], 0, vocab - 1)                       # (TT, 1)
    iota = lax.broadcasted_iota(jnp.int32, (ids.shape[0], vocab), 1)  # (TT, V)
    onehot = (ids == iota).astype(emb_ref.dtype)
    rows = jnp.dot(onehot, emb_ref[...], preferred_element_type=jnp.float32)
    out_ref[...] = (rows * scale).astype(out_ref.dtype)


def _token_embedding_onehot(ids, emb_table, scale, token_tile):
    N = ids.shape[0]
    V, E = emb_table.shape
    itemsize = jnp.dtype(emb_table.dtype).itemsize

    tt = 128 if token_tile is None else token_tile
    tt = max(8, min(_round_up(tt, 8), _round_up(N, 8)))
    n_steps = _cdiv(N, tt)
    n_pad = n_steps * tt
    if n_pad != N:
        ids = jnp.pad(ids, (0, n_pad - N))          # pad with id 0 (a valid row)
    ids2d = ids.reshape(n_pad, 1)

    kernel = functools.partial(_onehot_embed_kernel, scale=scale, vocab=V)
    vmem_limit = int(min(48 << 20, max(16 << 20, 2 * V * E * itemsize + (8 << 20))))

    out = pl.pallas_call(
        kernel,
        out_shape=jax.ShapeDtypeStruct((n_pad, E), emb_table.dtype),
        grid_spec=pl.GridSpec(
            grid=(n_steps,),
            in_specs=[
                pl.BlockSpec((tt, 1), lambda i: (i, 0)),
                # Grid-invariant block: the table is DMA'd once and stays in VMEM.
                pl.BlockSpec((V, E), lambda i: (0, 0)),
            ],
            out_specs=pl.BlockSpec((tt, E), lambda i: (i, 0)),
        ),
        compiler_params=pltpu.CompilerParams(
            dimension_semantics=("parallel",),
            vmem_limit_bytes=vmem_limit,
        ),
    )(ids2d, emb_table)
    return out[:N]


# ---------------------------------------------------------------------------
# Large-vocab path: table in HBM, manual-DMA row gather, double-buffered.
# ---------------------------------------------------------------------------
def _dma_gather_kernel(ids_ref, emb_hbm, out_ref, gbuf, sems, *,
                       scale, token_tile, unroll):
    """One grid step gathers `token_tile` embedding rows from HBM via DMA.

    ids_ref : (chunk_pad,) int32 in SMEM (scalar prefetch)
    emb_hbm : (V, E) table left in HBM (memory_space=pl.ANY)
    out_ref : (token_tile, E) output tile in VMEM
    gbuf    : (2, token_tile, E) VMEM double buffer for gathered rows
    sems    : (2,) DMA semaphores -- one per buffer slot; every row copy of a
              tile signals the same semaphore and is retired by ONE aggregate
              wait sized (token_tile, E).
    """
    step = pl.program_id(0)
    n_steps = pl.num_programs(0)
    vmax = emb_hbm.shape[0] - 1          # hoisted static bound
    slot = step & 1

    def issue_tile(tile_idx, buf_slot):
        base = tile_idx * token_tile

        @pl.loop(0, token_tile // unroll)
        def _(blk):
            t0 = blk * unroll
            for u in range(unroll):      # trace-time unroll: co-issue id loads,
                t = t0 + u               # clamp, address math and DMA pushes
                tok = jnp.clip(ids_ref[base + t], 0, vmax)
                pltpu.make_async_copy(
                    emb_hbm.at[pl.ds(tok, 1), :],
                    gbuf.at[buf_slot, pl.ds(t, 1), :],
                    sems.at[buf_slot],
                ).start()

    # Prime the pipeline: fetch tile 0 into slot 0 on the first grid step.
    @pl.when(step == 0)
    def _():
        issue_tile(0, 0)

    # Issue the next tile into the other slot BEFORE waiting on this one:
    # slots use disjoint buffers/semaphores, SMEM id reads stay ahead of the
    # wait, and descriptor pushes overlap tile `step`'s in-flight transfers.
    @pl.when(step + 1 < n_steps)
    def _():
        issue_tile(step + 1, 1 - slot)

    # One aggregate wait per tile: the descriptor's byte size equals the sum
    # of the token_tile row transfers that signalled sems[slot].
    pltpu.make_async_copy(
        emb_hbm.at[pl.ds(0, token_tile), :],
        gbuf.at[slot],
        sems.at[slot],
    ).wait()

    # Single VPU pass: fold sqrt(emb_size) into the tile write.
    out_ref[...] = (gbuf[slot] * scale).astype(out_ref.dtype)


def _token_embedding_dma(ids, emb_table, scale, token_tile):
    N = ids.shape[0]
    V, E = emb_table.shape
    itemsize = jnp.dtype(emb_table.dtype).itemsize
    row_bytes = E * itemsize

    tt = 256 if token_tile is None else token_tile
    tt = max(8, min(_round_up(tt, 8), _round_up(N, 8)))
    # Keep gbuf double buffer + Pallas output double buffer inside ~16 MiB
    # (safe on v5e / v6e / v7x scoped VMEM alike).
    max_rows = max(8, (((16 << 20) // (4 * row_bytes)) // 8) * 8)
    tt = min(tt, max_rows)
    if V >= 8:
        # Keep the aggregate-wait descriptor (token_tile table rows) statically
        # in bounds.
        tt = min(tt, (V // 8) * 8)

    n_pad = _cdiv(N, tt) * tt
    if n_pad != N:
        ids = jnp.pad(ids, (0, n_pad - N))          # pad with id 0 (a valid row)

    unroll = 8
    kernel = functools.partial(_dma_gather_kernel, scale=scale,
                               token_tile=tt, unroll=unroll)
    vmem_limit = int(min(48 << 20, max(16 << 20, 4 * tt * row_bytes + (4 << 20))))

    # SMEM guard: a 1-D int32[n] scalar-prefetch array pads to next_pow2(4n);
    # chunk the pallas_call so the padded id array stays <= ~256 KiB.
    max_tokens_per_call = max(tt, ((1 << 16) // tt) * tt)

    def run_chunk(ids_chunk):
        n_steps = ids_chunk.shape[0] // tt
        return pl.pallas_call(
            kernel,
            out_shape=jax.ShapeDtypeStruct((ids_chunk.shape[0], E), emb_table.dtype),
            grid_spec=pltpu.PrefetchScalarGridSpec(
                num_scalar_prefetch=1,
                grid=(n_steps,),
                # Embedding table stays in HBM; rows are gathered by manual DMA.
                in_specs=[pl.BlockSpec(memory_space=pl.ANY)],
                out_specs=pl.BlockSpec((tt, E), lambda i, ids_sref: (i, 0)),
                scratch_shapes=[
                    pltpu.VMEM((2, tt, E), emb_table.dtype),
                    pltpu.SemaphoreType.DMA((2,)),
                ],
            ),
            compiler_params=pltpu.CompilerParams(
                # Double-buffer scratch / semaphore state carries across steps,
                # so the grid axis must run sequentially.
                dimension_semantics=("arbitrary",),
                vmem_limit_bytes=vmem_limit,
            ),
        )(ids_chunk, emb_table)

    if n_pad <= max_tokens_per_call:
        out = run_chunk(ids)
    else:
        outs = [run_chunk(ids[s:s + max_tokens_per_call])
                for s in range(0, n_pad, max_tokens_per_call)]
        out = jnp.concatenate(outs, axis=0)
    return out[:N]


# ---------------------------------------------------------------------------
# Public wrapper: tokens (...,) int -> emb_table[tokens] * sqrt(E).
# ---------------------------------------------------------------------------
def token_embedding(tokens, emb_table, *, token_tile=None, force_dma_path=False):
    lead_shape = tokens.shape
    V, E = emb_table.shape
    N = int(math.prod(lead_shape)) if lead_shape else 1
    scale = math.sqrt(float(E))
    itemsize = jnp.dtype(emb_table.dtype).itemsize

    ids = tokens.astype(jnp.int32).reshape(N)

    # Small-table fast path: keep the whole table VMEM-resident and gather with
    # a one-hot matmul on the otherwise-idle MXU (cutoff is conservative enough
    # for v7x's 64 MiB VMEM as well).
    table_bytes = V * E * itemsize
    use_onehot = (not force_dma_path) and (table_bytes <= (8 << 20)) and (V <= 1024)

    if use_onehot:
        flat = _token_embedding_onehot(ids, emb_table, scale, token_tile)
    else:
        flat = _token_embedding_dma(ids, emb_table, scale, token_tile)
    return flat.reshape(*lead_shape, E)


if __name__ == "__main__":
    # Small shapes consistent with the module: vocab=64, emb_size=128, batch=2, seq=8.
    vocab_size, emb_size = 64, 128
    batch, seq = 2, 8

    key = jax.random.PRNGKey(0)
    k_emb, k_tok = jax.random.split(key)

    # nn.Embedding default init is N(0, 1).
    emb_table = jax.random.normal(k_emb, (vocab_size, emb_size), dtype=jnp.float32)
    tokens = jax.random.randint(k_tok, (batch, seq), 0, vocab_size, dtype=jnp.int32)

    # Reference: plain-JAX gather semantics of nn.Embedding * sqrt(E).
    ref = jnp.take(emb_table, tokens, axis=0) * math.sqrt(emb_size)

    # 1) Fast path (table resident in VMEM, one-hot gather on the MXU).
    out = jax.block_until_ready(token_embedding(tokens, emb_table))
    assert out.shape == (batch, seq, emb_size)
    assert jnp.allclose(out, ref, atol=1e-5, rtol=1e-5)

    # 2) Fast path with a smaller tile so the grid actually iterates.
    out_tiled = jax.block_until_ready(token_embedding(tokens, emb_table, token_tile=8))
    assert jnp.allclose(out_tiled, ref, atol=1e-5, rtol=1e-5)

    # 3) Large-vocab path (table in HBM, manual-DMA gather); token_tile=8 gives
    #    two grid steps so the double-buffered prefetch + aggregate wait runs.
    out_dma = jax.block_until_ready(
        token_embedding(tokens, emb_table, token_tile=8, force_dma_path=True))
    assert jnp.allclose(out_dma, ref, atol=1e-5, rtol=1e-5)

    print("KERNEL_OK")
</pallas_src>

<mosaic_0001>
module attributes {stable_mosaic.version = 11 : i64} {
  func.func @_onehot_embed_kernel(%arg0: i32, %arg1: memref<16x1xi32, #tpu.memory_space<vmem>>, %arg2: memref<64x128xf32, #tpu.memory_space<vmem>>, %arg3: memref<16x128xf32, #tpu.memory_space<vmem>>) attributes {dimension_semantics = [#tpu.dimension_semantics<parallel>], iteration_bounds = array<i64: 1>, scalar_prefetch = 0 : i64, scratch_operands = 0 : i64, tpu.core_type = #tpu.core_type<tc>, window_params = [{transform_indices = @transform_0, window_bounds = array<i64: 16, 1>}, {pipeline_mode = #tpu.pipeline_mode<synchronous>, transform_indices = @transform_1, window_bounds = array<i64: 64, 128>}, {transform_indices = @transform_2, window_bounds = array<i64: 16, 128>}]} {
    %c0 = arith.constant 0 : index
    %c0_0 = arith.constant 0 : index
    %0 = vector.load %arg1[%c0, %c0_0] : memref<16x1xi32, #tpu.memory_space<vmem>>, vector<16x1xi32>
    %c0_i32 = arith.constant 0 : i32
    %c63_i32 = arith.constant 63 : i32
    %1 = vector.broadcast %c0_i32 : i32 to vector<16x1xi32>
    %2 = arith.maxsi %1, %0 : vector<16x1xi32>
    %3 = vector.broadcast %c63_i32 : i32 to vector<16x1xi32>
    %4 = arith.minsi %3, %2 : vector<16x1xi32>
    %5 = tpu.iota {dimensions = array<i32: 1>} : vector<16x64xi32>
    %6 = vector.broadcast %4 : vector<16x1xi32> to vector<16x64xi32>
    %7 = arith.cmpi eq, %6, %5 : vector<16x64xi32>
    %8 = arith.extui %7 : vector<16x64xi1> to vector<16x64xi32>
    %9 = arith.sitofp %8 : vector<16x64xi32> to vector<16x64xf32>
    %c0_1 = arith.constant 0 : index
    %c0_2 = arith.constant 0 : index
    %10 = vector.load %arg2[%c0_1, %c0_2] : memref<64x128xf32, #tpu.memory_space<vmem>>, vector<64x128xf32>
    %cst = arith.constant dense<0.000000e+00> : vector<16x128xf32>
    %11 = tpu.matmul %9, %10, %cst {dimension_numbers = #tpu.dot_dimension_numbers<[1], [0], [0], [1], [0, 0, 1, 1], [], []>} : vector<16x64xf32>, vector<64x128xf32>, vector<16x128xf32> -> vector<16x128xf32>
    %cst_3 = arith.constant 11.3137083 : f32
    %12 = vector.broadcast %cst_3 : f32 to vector<16x128xf32>
    %13 = arith.mulf %11, %12 : vector<16x128xf32>
    %c0_4 = arith.constant 0 : index
    %c0_5 = arith.constant 0 : index
    %14 = vector.load %arg3[%c0_4, %c0_5] : memref<16x128xf32, #tpu.memory_space<vmem>>, vector<16x128xf32>
    tpu.vector_store %arg3[%c0_4, %c0_5], %13 {strides = array<i32>} : memref<16x128xf32, #tpu.memory_space<vmem>>, vector<16x128xf32>,
    return
  }
  func.func @transform_0(%arg0: i32) -> (i32, i32) {
    %c0_i32 = arith.constant 0 : i32
    %c0_i32_0 = arith.constant 0 : i32
    return %arg0, %c0_i32 : i32, i32
  }
  func.func @transform_1(%arg0: i32) -> (i32, i32) {
    %c0_i32 = arith.constant 0 : i32
    %c0_i32_0 = arith.constant 0 : i32
    %c0_i32_1 = arith.constant 0 : i32
    return %c0_i32, %c0_i32_0 : i32, i32
  }
  func.func @transform_2(%arg0: i32) -> (i32, i32) {
    %c0_i32 = arith.constant 0 : i32
    %c0_i32_0 = arith.constant 0 : i32
    return %arg0, %c0_i32 : i32, i32
  }
}

</mosaic_0001>

<bundles_post_ra>
// kernel: tpu_custom_call.1
= control target key start
LH: loop header
LB: loop body
LE: loop exit
PB: predicated region body
PF: predicated region fallthrough
CT: control target
= control target key end

     0   :  { %7 = vsyncpa [#allocation3], 0  ;;  %s322_s0 = inlined_call_operand.vmem [shape: s32[16,1], index: 0, kind: input, shape index: {}]   ;;  %s323_s1 = inlined_call_operand.hbm [shape: f32[64,128], index: 1, kind: input, shape index: {}]   ;;  %s324_s2 = inlined_call_operand.hbm [shape: f32[16,128], index: 2, kind: output, shape index: {}]  }
   0x1   :  { %8 = vsyncpa [#allocation4], 0  ;;  %s265_s9 = smov [#allocation2]   ;;  %s217_s13 = scalar_lea.hbm %s323_s1, 1024 }
   0x2   :  { %s16_s10 = sshll.u32 %s265_s9, 4  ;;  %p218_p0 = scmp.ne.s32.totalorder %s323_s1, %s217_s13  ;;  %s17_s10 = int_to_ptr.vmem [resolvable:$true] %s16_s10 }
   0x3   :  { %p221_p1 = scmp.lt.u32.totalorder %s217_s13, %s323_s1 }
   0x5   :  { %p223_p2 = pnand %p221_p1, %p218_p0 }
   0x7   :  { %226 = shalt.err (!%p223_p2)
}
   0x8   :  { %s227_s18 = scalar_lea.vmem %s17_s10, 1024  ;;  %p232_p4 = scmp.lt.s32.totalorder %s17_s10, %s17_s10 }
   0x9   :  { %p228_p3 = scmp.ne.s32.totalorder %s17_s10, %s227_s18  ;;  %p233_p5 = scmp.lt.s32.totalorder %s227_s18, %s227_s18 }
   0xb   :  { %p234_p6 = por %p233_p5, %p232_p4 }
   0xd   :  { %p235_p7 = pnand %p234_p6, %p228_p3 }
   0xf   :  { %238 = shalt.err (!%p235_p7)
}
  0x10   :  { %s266_s19 = smov 128   ;;  %s267_s20 = smov 8  }
  0x11   :  { %22 = dma.hbm_to_vmem [thread:$0]  %s323_s1, 1024, %s17_s10, [#allocation3], %s266_s19, %s266_s19, %s267_s20  }
  0x12   :  { %261 = dma.done.wait [#allocation3], 1024  }
  0x13   :  { %262 = vsyncadd [#allocation3], 4294966272  ;;  %v268_v0 = vmov 0   ;;  %v26_v1 = vld [vmem:[%s322_s0] sm:$0xff]  ;;  %v27_v2 = vld [vmem:[%s322_s0 + $0x8] sm:$0xff]  ;;  %v36_v19 = vlaneseq  ;;  %vm58_vm4 = vcmask 523264  }
  0x14   :  { %216 = vset.pattern.permute.xlu0 %v268_v0  ;;  %v50_v3 = vld [vmem:[#allocation2] sm:$0xff]  ;;  %vm28_vm0 = vcmp.gt.s32.totalorder %v26_v1, 0  ;;  %vm30_vm1 = vcmp.gt.s32.totalorder %v27_v2, 0  ;;  %v51_v4 = vld [vmem:[#allocation2 + $0x8] sm:$0xff]  ;;  %v52_v5 = vld [vmem:[#allocation2 + $0x10] sm:$0xff]  ;;  %v269_v22 = vmov 0.0  }
  0x15   :  { %v53_v6 = vld [vmem:[#allocation2 + $0x18] sm:$0xff]  ;;  %v29_v7 = vsel %vm28_vm0, %v26_v1, 0  ;;  %v31_v8 = vsel %vm30_vm1, %v27_v2, 0  ;;  %v194_v9 = vpack.c.bf16 %v51_v4, %v50_v3  ;;  %v54_v11 = vld [vmem:[#allocation2 + $0x20] sm:$0xff]  ;;  %v55_v12 = vld [vmem:[#allocation2 + $0x28] sm:$0xff]  ;;  %v37_v20 = vand.u32 127, %v36_v19 }
  0x16   :  { %v198_v10 = vpack.c.bf16 %v53_v6, %v52_v5  ;;  %vm32_vm2 = vcmp.lt.s32.totalorder %v29_v7, 63  ;;  %vm34_vm3 = vcmp.lt.s32.totalorder %v31_v8, 63  ;;  %v202_v15 = vpack.c.bf16 %v55_v12, %v54_v11  ;;  %v56_v16 = vld [vmem:[#allocation2 + $0x30] sm:$0xff]  ;;  %v57_v17 = vld [vmem:[#allocation2 + $0x38] sm:$0xff]  ;;  %s270_s0 = smov [#allocation5]  }
  0x17   :  { %v33_v13 = vsel %vm32_vm2, %v29_v7, 63  ;;  %195 = vmatprep.subr.bf16.mxu0 %v194_v9  ;;  %v35_v14 = vsel %vm34_vm3, %v31_v8, 63  ;;  %v206_v18 = vpack.c.bf16 %v57_v17, %v56_v16  ;;  %s149_s1 = sshll.u32 %s270_s0, 4  ;;  %s150_s1 = int_to_ptr.vmem [resolvable:$true] %s149_s1 }
  0x18   :  { %39 = vperm.xlu0 %216, %v33_v13   ;;  %197 = vmatpush3.bf16.msra.mxu0 %v194_v9  ;;  %s239_s27 = scalar_lea.vmem %s150_s1, 256  ;;  %p244_p9 = scmp.lt.s32.totalorder %s150_s1, %s150_s1 }
  0x19   :  { %199 = vmatprep.subr.bf16.mxu0 %v198_v10  ;;  %p240_p8 = scmp.ne.s32.totalorder %s150_s1, %s239_s27  ;;  %p245_p10 = scmp.lt.s32.totalorder %s239_s27, %s239_s27 }
  0x1b   :  { %p246_p11 = por %p245_p10, %p244_p9 }
  0x1c   :  { %42 = vperm.xlu0 %216, %v35_v14   ;;  %201 = vmatpush3.bf16.msra.mxu0 %v198_v10 }
  0x1d   :  { %203 = vmatprep.subr.bf16.mxu0 %v202_v15  ;;  %p247_p12 = pnand %p246_p11, %p240_p8 }
  0x20   :  { %205 = vmatpush3.bf16.msra.mxu0 %v202_v15 }
  0x21   :  { %207 = vmatprep.subr.bf16.mxu0 %v206_v18 }
  0x24   :  { %209 = vmatpush3.bf16.msra.mxu0 %v206_v18 }
  0x97   :  { %v40_v21 = vpop.permute.xlu0 %39 }
  0x98   :  { %vm44_vm5 = vcmp.eq.s32.totalorder %v40_v21, %v37_v20 }
  0x99   :  { %v161_v23 = vsel %vm44_vm5, 1.0, %v269_v22 }
  0x9a   :  { %191 = vmatprep.mubr.msk.f32.mxu0 %vm58_vm4, %v161_v23 }
  0x9b   :  { %v43_v24 = vpop.permute.xlu0 %42 }
  0x9c   :  { %vm45_vm6 = vcmp.eq.s32.totalorder %v43_v24, %v37_v20 }
  0x9d   :  { %v162_v25 = vsel %vm45_vm6, 1.0, %v269_v22 }
  0x9e   :  { %192 = vmatmul.mubr.msk.f32.vlgmr.msra.gmra.mrb[0].mxu0 %vm58_vm4, %v162_v25 }
 0x171   :  { %v193_v26 = vpop.f32.mrb[0].mxu0 }
 0x172   :  { %v141_v27 = vmul.f32 11.313708, %v193_v26  ;;  %v131_v28 = vpop.f32.mrb[1].mxu0 }
 0x173   :  { %v140_v29 = vmul.f32 11.313708, %v131_v28 }
 0x174   :  { %143 = vst [vmem:[#allocation5 + $0x8] sm:$0xff] %v141_v27 }
 0x175   :  { %142 = vst [vmem:[#allocation5] sm:$0xff] %v140_v29 }
 0x176   :  { %250 = shalt.err (!%p247_p12)
}
 0x177   :  { %s251_s30 = scalar_lea.hbm %s324_s2, 256 }
 0x178   :  { %p252_p13 = scmp.ne.s32.totalorder %s324_s2, %s251_s30  ;;  %p255_p0 = scmp.lt.u32.totalorder %s251_s30, %s324_s2 }
 0x17a   :  { %p257_p1 = pnand %p255_p0, %p252_p13 }
 0x17c   :  { %260 = shalt.err (!%p257_p1)
}
 0x17d   :  { %155 = dma.vmem_to_hbm [thread:$0]  %s150_s1, 256, %s324_s2, [#allocation4], %s266_s19, %s266_s19, %s267_s20  }
 0x17e   :  { %263 = dma.done.wait [#allocation4], 256  }
 0x17f   :  { %264 = vsyncadd [#allocation4], 4294967040 }
 0x180   :  { %159 = vsyncpa [#allocation3], 1 }
 0x181   :  { %160 = vsyncpa [#allocation4], 1 }

</bundles_post_ra>
